<compile_context>
chip_gen: v7x
topology: tpu7x:2x2x1
jax: 0.10.0
libtpu: 0.0.40
codegen_flags: <defaults>
</compile_context>

<pallas_src>
import jax
import jax.numpy as jnp
from jax import lax
from jax.experimental import pallas as pl
from jax.experimental.pallas import tpu as pltpu  # noqa: F401  (grid-free kernel; defaults suffice)

# ---------------- model sizes (small, consistent with the module) ----------
WORD_VOCAB = 100
POS_VOCAB = 20
AUDIO_DIM = 256      # module default 768; small synthetic size
HIDDEN = 128         # module default 256
NUM_REL = 16         # module default 50
WORD_DIM = 100
POS_DIM = 50
WP_DIM = WORD_DIM + POS_DIM          # 150

B = 2
S = 8                # sequence length
T = 64               # number of audio frames (50 fps)
H = HIDDEN
R = NUM_REL
SR = S * R           # 128  (== H, required for the aux packing below)
BT = B * T           # 128
BS = B * S           # 16

assert SR == H, "aux packing assumes S*R == HIDDEN (both 128-lane dense)"


# ---------------- Pallas kernel --------------------------------------------
def parser_kernel(
    wp_ref,          # (BS, 150)        word||pos embeddings (flattened batch)
    mask_ref,        # (BS, BT)         block-diagonal normalized alignment mask
    aud_ref,         # (BT, A)          flattened audio frames
    w1wp_ref,        # (150, H)         mlp[0] weight, word/pos slice
    w1au_ref,        # (A, H)           aW @ w1_audio   (audio_proj folded in)
    wcat_ref,        # (H, 2H + 2*SR)   [w2 | arcW | relWd_tiled | arcW@relWh_tiled]
    aux_ref,         # (S+4, SR)        [sel (S rows); b1_fused; b2; arcb; rel_bias]
    arc_ref,         # (BS, BS)         full head @ combined^T (diag blocks used)
    rel_ref,         # (BS, SR)         -> reshaped to (B, S, S, R) outside
):
    f32 = jnp.float32

    aux = aux_ref[...]
    sel = aux[0:S, :]                     # (S, SR)   f32 routing mask
    b1 = aux[S:S + 1, :]                  # (1, H)
    b2 = aux[S + 1:S + 2, :]              # (1, H)
    arcb = aux[S + 2:S + 3, :]            # (1, H)
    relb = aux[S + 3:S + 4, :]            # (1, SR)

    # ---- align_audio (masked mean): ONE block-diagonal MXU matmul ----------
    aligned = jnp.dot(mask_ref[...], aud_ref[...],
                      preferred_element_type=f32)          # (BS, A)

    # ---- MLP layer 1 with audio_proj folded in (split over [wp|audio]) ----
    h = (jnp.dot(wp_ref[...], w1wp_ref[...], preferred_element_type=f32)
         + jnp.dot(aligned, w1au_ref[...], preferred_element_type=f32)
         + b1)
    h = jnp.maximum(h, 0.0)

    # ---- MLP layer 2 (w2 is the first 128 lanes of wcat) ----
    h = jnp.dot(h, wcat_ref[:, :H], preferred_element_type=f32) + b2
    h = jnp.maximum(h, 0.0)                                 # (BS, H) == `combined`

    # ---- one fused scorer matmul over combined ----
    big = jnp.dot(h, wcat_ref[:, H:], preferred_element_type=f32)  # (BS, H + 2*SR)
    head = big[:, :H] + arcb              # (BS, H)   arc_scorer(combined)
    t_all = big[:, H:H + SR]              # row b*S+j : dep_j . relWd[:, r] (tiled over j')
    rel_h = big[:, H + SR:] + relb        # row b*S+i : head_i . relWh[:, r] + relb[r]

    # ---- arc: ONE (16,128)@(128,16) matmul over the whole flat batch ----
    # arc_full[b*S+i, b'*S+j] = head_{b,i} . dep_{b',j}; wrapper keeps diag blocks.
    arc_ref[...] = lax.dot_general(head, h, (((1,), (1,)), ((), ())),
                                   preferred_element_type=f32)

    # ---- rel: route dep_j's rel scores to lane group j (sublane/XLU reduce) ----
    for b in range(B):                    # B = 2, unrolled
        lo = b * S
        # q_b[0, j*R + r] = dep_{b,j} . relWd[:, r]
        q_b = jnp.sum(sel * t_all[lo:lo + S, :], axis=0, keepdims=True)   # (1, SR)
        # rel[b, i, j, r] = head_i.relWh[:,r] + dep_j.relWd[:,r] + relb[r]
        rel_ref[lo:lo + S, :] = rel_h[lo:lo + S, :] + q_b


def run_parser(wp_flat, mask_bd, aud_flat, packed):
    arc_full, rel_flat = pl.pallas_call(
        parser_kernel,
        out_shape=(jax.ShapeDtypeStruct((BS, BS), jnp.float32),
                   jax.ShapeDtypeStruct((BS, SR), jnp.float32)),
    )(wp_flat, mask_bd, aud_flat, *packed)
    # extract the per-batch 8x8 diagonal blocks of arc_full
    af = arc_full.reshape(B, S, B, S)
    arc = af[jnp.arange(B), :, jnp.arange(B), :]            # (B, S, S)
    rel = rel_flat.reshape(B, S, S, R)
    return arc, rel


# ---------------- plain-JAX glue (inside the jitted forward) ----------------
def make_align_mask(start_times, end_times, num_frames):
    """Normalized mask M s.t. M @ audio == the PyTorch per-span mean (0 if invalid)."""
    start = (start_times * 50.0).astype(jnp.int32)          # trunc like int()
    end = (end_times * 50.0).astype(jnp.int32)
    valid = (end > start) & (end <= num_frames)              # (B, S)
    t = jnp.arange(num_frames)
    m = (t[None, None, :] >= start[..., None]) & (t[None, None, :] < end[..., None])
    m = m & valid[..., None]
    mf = m.astype(jnp.float32)                               # (B, S, T)
    cnt = jnp.maximum(mf.sum(-1, keepdims=True), 1.0)
    return mf / cnt


def pack_params(raw):
    """Fold / tile / pack the raw (in,out)-layout weights into the kernel's fused forms."""
    (aW, ab, w1, b1, w2, b2, arcW, arcb, relW, relb) = raw
    w1wp = w1[:WP_DIM]                              # (150, H)
    w1au_raw = w1[WP_DIM:]                          # (100, H)
    w1au = aW @ w1au_raw                            # (A, H)  audio_proj folded into mlp[0]
    b1_fused = b1 + ab @ w1au_raw                   # (1, H)
    relWh, relWd = relW[:H], relW[H:]               # (H, R) each
    relWh_t = jnp.tile(relWh, (1, S))               # (H, SR)
    relWd_t = jnp.tile(relWd, (1, S))               # (H, SR)
    # one lane-concatenated weight slab: [w2 | arcW | relWd_t | arcW @ relWh_t]
    wcat = jnp.concatenate([w2, arcW, relWd_t, arcW @ relWh_t], axis=1)   # (H, 2H+2SR)
    rel_bias = arcb @ relWh_t + jnp.tile(relb, (1, S))                    # (1, SR)
    # routing selector sel[j, j'*R + r] = (j == j')
    col_grp = jnp.arange(SR) // R
    sel = (col_grp[None, :] == jnp.arange(S)[:, None]).astype(jnp.float32)  # (S, SR)
    aux = jnp.concatenate([sel, b1_fused, b2, arcb, rel_bias], axis=0)      # (S+4, SR)
    return (w1wp, w1au, wcat, aux)


@jax.jit
def forward(word_table, pos_table, packed, words, pos, audio_feats,
            start_times, end_times):
    wp = jnp.concatenate([word_table[words], pos_table[pos]], axis=-1)    # (B,S,150)
    wp_flat = wp.reshape(BS, WP_DIM).astype(jnp.float32)
    mask_norm = make_align_mask(start_times, end_times, audio_feats.shape[1])  # (B,S,T)
    # block-diagonal placement: mask_bd[b*S+i, b*T+t] = mask_norm[b, i, t]
    eye = jnp.eye(B, dtype=jnp.float32)
    mask_bd = (eye[:, None, :, None] * mask_norm[:, :, None, :]).reshape(BS, BT)
    aud_flat = audio_feats.reshape(BT, AUDIO_DIM).astype(jnp.float32)
    return run_parser(wp_flat, mask_bd, aud_flat, packed)

# TODO(synk): if this forward is called repeatedly, add a grid over batch-chunks
# with constant-index weight BlockSpecs so weights stay VMEM-resident per call.


# ---------------- pure-JAX reference (unfused, original param layout) --------
def align_audio_ref(audio_feats, start_times, end_times):
    _, T_, _ = audio_feats.shape
    start = (start_times * 50.0).astype(jnp.int32)
    end = (end_times * 50.0).astype(jnp.int32)
    valid = (end > start) & (end <= T_)
    t = jnp.arange(T_)
    m = (t[None, None, :] >= start[..., None]) & (t[None, None, :] < end[..., None])
    m = m & valid[..., None]
    mf = m.astype(audio_feats.dtype)
    summed = jnp.einsum('bst,bta->bsa', mf, audio_feats)
    cnt = jnp.maximum(mf.sum(-1, keepdims=True), 1.0)
    return jnp.where(valid[..., None], summed / cnt, 0.0)


def reference_forward(word_table, pos_table, raw, words, pos, audio, st, et):
    (aW, ab, w1, b1, w2, b2, arcW, arcb, relW, relb) = raw
    wp = jnp.concatenate([word_table[words], pos_table[pos]], axis=-1)
    aligned = align_audio_ref(audio, st, et)
    audio_emb = aligned @ aW + ab
    comb = jnp.concatenate([wp, audio_emb], axis=-1)
    h = jax.nn.relu(comb @ w1 + b1)
    h = jax.nn.relu(h @ w2 + b2)
    head = h @ arcW + arcb
    dep = h
    arc = jnp.einsum('bih,bjh->bij', head, dep)
    relWh, relWd = relW[:H], relW[H:]
    rel = (head @ relWh)[:, :, None, :] + (dep @ relWd)[:, None, :, :] + relb
    return arc, rel


def init_params(key):
    ks = jax.random.split(key, 12)
    s = 0.02
    word_table = jax.random.normal(ks[0], (WORD_VOCAB, WORD_DIM), jnp.float32) * s
    pos_table = jax.random.normal(ks[1], (POS_VOCAB, POS_DIM), jnp.float32) * s
    # linear weights stored transposed: (in_features, out_features)
    aW = jax.random.normal(ks[2], (AUDIO_DIM, WORD_DIM), jnp.float32) * s
    ab = jax.random.normal(ks[3], (1, WORD_DIM), jnp.float32) * s
    w1 = jax.random.normal(ks[4], (WP_DIM + WORD_DIM, HIDDEN), jnp.float32) * s
    b1 = jax.random.normal(ks[5], (1, HIDDEN), jnp.float32) * s
    w2 = jax.random.normal(ks[6], (HIDDEN, HIDDEN), jnp.float32) * s
    b2 = jax.random.normal(ks[7], (1, HIDDEN), jnp.float32) * s
    arcW = jax.random.normal(ks[8], (HIDDEN, HIDDEN), jnp.float32) * s
    arcb = jax.random.normal(ks[9], (1, HIDDEN), jnp.float32) * s
    relW = jax.random.normal(ks[10], (2 * HIDDEN, NUM_REL), jnp.float32) * s
    relb = jax.random.normal(ks[11], (1, NUM_REL), jnp.float32) * s
    raw = (aW, ab, w1, b1, w2, b2, arcW, arcb, relW, relb)
    return word_table, pos_table, raw


if __name__ == "__main__":
    key = jax.random.PRNGKey(0)
    k_param, k_w, k_p, k_a, k_s, k_d = jax.random.split(key, 6)

    word_table, pos_table, raw_params = init_params(k_param)
    packed = pack_params(raw_params)

    words = jax.random.randint(k_w, (B, S), 0, WORD_VOCAB)
    pos = jax.random.randint(k_p, (B, S), 0, POS_VOCAB)
    audio_feats = jax.random.normal(k_a, (B, T, AUDIO_DIM), jnp.float32)
    start_times = jax.random.uniform(k_s, (B, S), jnp.float32, 0.0, 1.0)
    durations = jax.random.uniform(k_d, (B, S), jnp.float32, 0.02, 0.2)
    end_times = start_times + durations

    arc_scores, rel_scores = forward(word_table, pos_table, packed,
                                     words, pos, audio_feats,
                                     start_times, end_times)
    arc_scores = jax.block_until_ready(arc_scores)
    rel_scores = jax.block_until_ready(rel_scores)

    # sanity check against pure-JAX (unfused) reference
    arc_ref, rel_ref = reference_forward(word_table, pos_table, raw_params,
                                         words, pos, audio_feats,
                                         start_times, end_times)
    assert arc_scores.shape == (B, S, S)
    assert rel_scores.shape == (B, S, S, NUM_REL)
    assert jnp.allclose(arc_scores, arc_ref, atol=1e-4, rtol=1e-3)
    assert jnp.allclose(rel_scores, rel_ref, atol=1e-4, rtol=1e-3)

    # TODO(synk): Dropout(0.3) is treated as identity (eval-mode forward).
    print("KERNEL_OK")
</pallas_src>

<mosaic_0001>
module attributes {stable_mosaic.version = 11 : i64} {
  func.func @parser_kernel(%arg0: memref<16x150xf32, #tpu.memory_space<vmem>>, %arg1: memref<16x128xf32, #tpu.memory_space<vmem>>, %arg2: memref<128x256xf32, #tpu.memory_space<vmem>>, %arg3: memref<150x128xf32, #tpu.memory_space<vmem>>, %arg4: memref<256x128xf32, #tpu.memory_space<vmem>>, %arg5: memref<128x512xf32, #tpu.memory_space<vmem>>, %arg6: memref<12x128xf32, #tpu.memory_space<vmem>>, %arg7: memref<16x16xf32, #tpu.memory_space<vmem>>, %arg8: memref<16x128xf32, #tpu.memory_space<vmem>>) attributes {dimension_semantics = [], scalar_prefetch = 0 : i64, scratch_operands = 0 : i64, tpu.core_type = #tpu.core_type<tc>} {
    %c0 = arith.constant 0 : index
    %c0_0 = arith.constant 0 : index
    %0 = vector.load %arg6[%c0, %c0_0] : memref<12x128xf32, #tpu.memory_space<vmem>>, vector<12x128xf32>
    %1 = vector.extract_strided_slice %0 {offsets = [0, 0], sizes = [8, 128], strides = [1, 1]} : vector<12x128xf32> to vector<8x128xf32>
    %2 = vector.extract_strided_slice %0 {offsets = [8, 0], sizes = [1, 128], strides = [1, 1]} : vector<12x128xf32> to vector<1x128xf32>
    %3 = vector.extract_strided_slice %0 {offsets = [9, 0], sizes = [1, 128], strides = [1, 1]} : vector<12x128xf32> to vector<1x128xf32>
    %4 = vector.extract_strided_slice %0 {offsets = [10, 0], sizes = [1, 128], strides = [1, 1]} : vector<12x128xf32> to vector<1x128xf32>
    %5 = vector.extract_strided_slice %0 {offsets = [11, 0], sizes = [1, 128], strides = [1, 1]} : vector<12x128xf32> to vector<1x128xf32>
    %c0_1 = arith.constant 0 : index
    %c0_2 = arith.constant 0 : index
    %6 = vector.load %arg1[%c0_1, %c0_2] : memref<16x128xf32, #tpu.memory_space<vmem>>, vector<16x128xf32>
    %c0_3 = arith.constant 0 : index
    %c0_4 = arith.constant 0 : index
    %7 = vector.load %arg2[%c0_3, %c0_4] : memref<128x256xf32, #tpu.memory_space<vmem>>, vector<128x256xf32>
    %cst = arith.constant dense<0.000000e+00> : vector<16x256xf32>
    %8 = tpu.matmul %6, %7, %cst {dimension_numbers = #tpu.dot_dimension_numbers<[1], [0], [0], [1], [0, 0, 1, 1], [], []>} : vector<16x128xf32>, vector<128x256xf32>, vector<16x256xf32> -> vector<16x256xf32>
    %c0_5 = arith.constant 0 : index
    %c0_6 = arith.constant 0 : index
    %9 = vector.load %arg0[%c0_5, %c0_6] : memref<16x150xf32, #tpu.memory_space<vmem>>, vector<16x150xf32>
    %c0_7 = arith.constant 0 : index
    %c0_8 = arith.constant 0 : index
    %10 = vector.load %arg3[%c0_7, %c0_8] : memref<150x128xf32, #tpu.memory_space<vmem>>, vector<150x128xf32>
    %cst_9 = arith.constant dense<0.000000e+00> : vector<16x128xf32>
    %11 = tpu.matmul %9, %10, %cst_9 {dimension_numbers = #tpu.dot_dimension_numbers<[1], [0], [0], [1], [0, 0, 1, 1], [], []>} : vector<16x150xf32>, vector<150x128xf32>, vector<16x128xf32> -> vector<16x128xf32>
    %c0_10 = arith.constant 0 : index
    %c0_11 = arith.constant 0 : index
    %12 = vector.load %arg4[%c0_10, %c0_11] : memref<256x128xf32, #tpu.memory_space<vmem>>, vector<256x128xf32>
    %cst_12 = arith.constant dense<0.000000e+00> : vector<16x128xf32>
    %13 = tpu.matmul %8, %12, %cst_12 {dimension_numbers = #tpu.dot_dimension_numbers<[1], [0], [0], [1], [0, 0, 1, 1], [], []>} : vector<16x256xf32>, vector<256x128xf32>, vector<16x128xf32> -> vector<16x128xf32>
    %14 = arith.addf %11, %13 : vector<16x128xf32>
    %15 = vector.broadcast %2 : vector<1x128xf32> to vector<16x128xf32>
    %16 = arith.addf %14, %15 : vector<16x128xf32>
    %cst_13 = arith.constant 0.000000e+00 : f32
    %17 = vector.broadcast %cst_13 : f32 to vector<16x128xf32>
    %18 = arith.maximumf %16, %17 : vector<16x128xf32>
    %c0_14 = arith.constant 0 : index
    %c0_15 = arith.constant 0 : index
    %19 = vector.load %arg5[%c0_14, %c0_15] : memref<128x512xf32, #tpu.memory_space<vmem>>, vector<128x128xf32>
    %cst_16 = arith.constant dense<0.000000e+00> : vector<16x128xf32>
    %20 = tpu.matmul %18, %19, %cst_16 {dimension_numbers = #tpu.dot_dimension_numbers<[1], [0], [0], [1], [0, 0, 1, 1], [], []>} : vector<16x128xf32>, vector<128x128xf32>, vector<16x128xf32> -> vector<16x128xf32>
    %21 = vector.broadcast %3 : vector<1x128xf32> to vector<16x128xf32>
    %22 = arith.addf %20, %21 : vector<16x128xf32>
    %cst_17 = arith.constant 0.000000e+00 : f32
    %23 = vector.broadcast %cst_17 : f32 to vector<16x128xf32>
    %24 = arith.maximumf %22, %23 : vector<16x128xf32>
    %c0_18 = arith.constant 0 : index
    %c128 = arith.constant 128 : index
    %25 = vector.load %arg5[%c0_18, %c128] : memref<128x512xf32, #tpu.memory_space<vmem>>, vector<128x384xf32>
    %cst_19 = arith.constant dense<0.000000e+00> : vector<16x384xf32>
    %26 = tpu.matmul %24, %25, %cst_19 {dimension_numbers = #tpu.dot_dimension_numbers<[1], [0], [0], [1], [0, 0, 1, 1], [], []>} : vector<16x128xf32>, vector<128x384xf32>, vector<16x384xf32> -> vector<16x384xf32>
    %27 = vector.extract_strided_slice %26 {offsets = [0, 0], sizes = [16, 128], strides = [1, 1]} : vector<16x384xf32> to vector<16x128xf32>
    %28 = vector.broadcast %4 : vector<1x128xf32> to vector<16x128xf32>
    %29 = arith.addf %27, %28 : vector<16x128xf32>
    %30 = vector.extract_strided_slice %26 {offsets = [0, 128], sizes = [16, 128], strides = [1, 1]} : vector<16x384xf32> to vector<16x128xf32>
    %31 = vector.extract_strided_slice %26 {offsets = [0, 256], sizes = [16, 128], strides = [1, 1]} : vector<16x384xf32> to vector<16x128xf32>
    %32 = vector.broadcast %5 : vector<1x128xf32> to vector<16x128xf32>
    %33 = arith.addf %31, %32 : vector<16x128xf32>
    %cst_20 = arith.constant dense<0.000000e+00> : vector<16x16xf32>
    %34 = tpu.matmul %29, %24, %cst_20 {dimension_numbers = #tpu.dot_dimension_numbers<[1], [1], [0], [0], [0, 0, 1, 0], [], []>} : vector<16x128xf32>, vector<16x128xf32>, vector<16x16xf32> -> vector<16x16xf32>
    %c0_21 = arith.constant 0 : index
    %c0_22 = arith.constant 0 : index
    %35 = vector.load %arg7[%c0_21, %c0_22] : memref<16x16xf32, #tpu.memory_space<vmem>>, vector<16x16xf32>
    tpu.vector_store %arg7[%c0_21, %c0_22], %34 {strides = array<i32>} : memref<16x16xf32, #tpu.memory_space<vmem>>, vector<16x16xf32>,
    %36 = vector.extract_strided_slice %30 {offsets = [0, 0], sizes = [8, 128], strides = [1, 1]} : vector<16x128xf32> to vector<8x128xf32>
    %37 = arith.mulf %1, %36 : vector<8x128xf32>
    %cst_23 = arith.constant dense<0.000000e+00> : vector<128xf32>
    %38 = vector.multi_reduction <add>, %37, %cst_23 [0] : vector<8x128xf32> to vector<128xf32>
    %39 = vector.shape_cast %38 : vector<128xf32> to vector<1x128xf32>
    %40 = vector.extract_strided_slice %33 {offsets = [0, 0], sizes = [8, 128], strides = [1, 1]} : vector<16x128xf32> to vector<8x128xf32>
    %41 = vector.broadcast %39 : vector<1x128xf32> to vector<8x128xf32>
    %42 = arith.addf %40, %41 : vector<8x128xf32>
    %c0_24 = arith.constant 0 : index
    %c0_25 = arith.constant 0 : index
    %43 = vector.load %arg8[%c0_24, %c0_25] : memref<16x128xf32, #tpu.memory_space<vmem>>, vector<8x128xf32>
    tpu.vector_store %arg8[%c0_24, %c0_25], %42 {strides = array<i32>} : memref<16x128xf32, #tpu.memory_space<vmem>>, vector<8x128xf32>,
    %44 = vector.extract_strided_slice %30 {offsets = [8, 0], sizes = [8, 128], strides = [1, 1]} : vector<16x128xf32> to vector<8x128xf32>
    %45 = arith.mulf %1, %44 : vector<8x128xf32>
    %cst_26 = arith.constant dense<0.000000e+00> : vector<128xf32>
    %46 = vector.multi_reduction <add>, %45, %cst_26 [0] : vector<8x128xf32> to vector<128xf32>
    %47 = vector.shape_cast %46 : vector<128xf32> to vector<1x128xf32>
    %48 = vector.extract_strided_slice %33 {offsets = [8, 0], sizes = [8, 128], strides = [1, 1]} : vector<16x128xf32> to vector<8x128xf32>
    %49 = vector.broadcast %47 : vector<1x128xf32> to vector<8x128xf32>
    %50 = arith.addf %48, %49 : vector<8x128xf32>
    %c8 = arith.constant 8 : index
    %c0_27 = arith.constant 0 : index
    %51 = vector.load %arg8[%c8, %c0_27] : memref<16x128xf32, #tpu.memory_space<vmem>>, vector<8x128xf32>
    tpu.vector_store %arg8[%c8, %c0_27], %50 {strides = array<i32>} : memref<16x128xf32, #tpu.memory_space<vmem>>, vector<8x128xf32>,
    return
  }
}

</mosaic_0001>

<bundles_post_ra>
// kernel: forward.1
= control target key start
LH: loop header
LB: loop body
LE: loop exit
PB: predicated region body
PF: predicated region fallthrough
CT: control target
= control target key end

     0   :  { %14 = vsyncpa [#allocation3], 0  ;;  %s1496_s0 = inlined_call_operand.vmem [shape: f32[16,150], index: 0, kind: input, shape index: {}]   ;;  %s1497_s1 = inlined_call_operand.vmem [shape: f32[16,128], index: 1, kind: input, shape index: {}]   ;;  %s1498_s2 = inlined_call_operand.vmem [shape: f32[128,256], index: 2, kind: input, shape index: {}]   ;;  %s1499_s3 = inlined_call_operand.vmem [shape: f32[150,128], index: 3, kind: input, shape index: {}]   ;;  %s1500_s4 = inlined_call_operand.hbm [shape: f32[256,128], index: 4, kind: input, shape index: {}]   ;;  %s1501_s5 = inlined_call_operand.hbm [shape: f32[128,512], index: 5, kind: input, shape index: {}]   ;;  %s1502_s6 = inlined_call_operand.vmem [shape: f32[12,128], index: 6, kind: input, shape index: {}]   ;;  %s1503_s7 = inlined_call_operand.vmem [shape: f32[16,16], index: 7, kind: output, shape index: {0}]   ;;  %s1504_s8 = inlined_call_operand.vmem [shape: f32[16,128], index: 8, kind: output, shape index: {1}]  }
   0x1   :  { %15 = vsyncpa [#allocation5], 0  ;;  %s1213_s27 = smov [#allocation2]   ;;  %s1165_s9 = scalar_lea.hbm %s1500_s4, 4096 }
   0x2   :  { %s29_s28 = sshll.u32 %s1213_s27, 4  ;;  %p1166_p0 = scmp.ne.s32.totalorder %s1500_s4, %s1165_s9  ;;  %s30_s28 = int_to_ptr.vmem [resolvable:$true] %s29_s28 }
   0x3   :  { %p1169_p1 = scmp.lt.u32.totalorder %s1165_s9, %s1500_s4 }
   0x5   :  { %p1171_p2 = pnand %p1169_p1, %p1166_p0 }
   0x7   :  { %1174 = shalt.err (!%p1171_p2)
}
   0x8   :  { %s1175_s14 = scalar_lea.vmem %s30_s28, 4096  ;;  %p1180_p4 = scmp.lt.s32.totalorder %s30_s28, %s30_s28 }
   0x9   :  { %p1176_p3 = scmp.ne.s32.totalorder %s30_s28, %s1175_s14  ;;  %p1181_p5 = scmp.lt.s32.totalorder %s1175_s14, %s1175_s14 }
   0xb   :  { %p1182_p6 = por %p1181_p5, %p1180_p4 }
   0xd   :  { %p1183_p7 = pnand %p1182_p6, %p1176_p3 }
   0xf   :  { %1186 = shalt.err (!%p1183_p7)
}
  0x10   :  { %s1214_s15 = smov 128   ;;  %s1215_s16 = smov 8  }
  0x11   :  { %35 = dma.hbm_to_vmem [thread:$0]  %s1500_s4, 4096, %s30_s28, [#allocation3], %s1214_s15, %s1214_s15, %s1215_s16  }
  0x12   :  { %s1216_s19 = smov [#allocation4]   ;;  %s1187_s23 = scalar_lea.hbm %s1501_s5, 8192 }
  0x13   :  { %s41_s20 = sshll.u32 %s1216_s19, 4  ;;  %p1188_p8 = scmp.ne.s32.totalorder %s1501_s5, %s1187_s23  ;;  %s42_s20 = int_to_ptr.vmem [resolvable:$true] %s41_s20 }
  0x14   :  { %p1191_p9 = scmp.lt.u32.totalorder %s1187_s23, %s1501_s5 }
  0x16   :  { %p1193_p10 = pnand %p1191_p9, %p1188_p8 }
  0x18   :  { %1196 = shalt.err (!%p1193_p10)
}
  0x19   :  { %s1197_s29 = scalar_lea.vmem %s42_s20, 8192  ;;  %p1202_p12 = scmp.lt.s32.totalorder %s42_s20, %s42_s20 }
  0x1a   :  { %p1198_p11 = scmp.ne.s32.totalorder %s42_s20, %s1197_s29  ;;  %p1203_p13 = scmp.lt.s32.totalorder %s1197_s29, %s1197_s29 }
  0x1c   :  { %p1204_p0 = por %p1203_p13, %p1202_p12 }
  0x1e   :  { %p1205_p1 = pnand %p1204_p0, %p1198_p11 }
  0x20   :  { %1208 = shalt.err (!%p1205_p1)
}
  0x21   :  { %s1217_s4 = smov 512   ;;  %s1218_s28 = smov 32  }
  0x22   :  { %47 = dma.hbm_to_vmem [thread:$0]  %s1501_s5, 8192, %s42_s20, [#allocation5], %s1217_s4, %s1217_s4, %s1218_s28  }
  0x23   :  { %1209 = dma.done.wait [#allocation3], 4096  }
  0x24   :  { %1210 = vsyncadd [#allocation3], 4294963200 }
  0x25   :  { %1211 = dma.done.wait [#allocation5], 8192  }
  0x26   :  { %1212 = vsyncadd [#allocation5], 4294959104  ;;  %v1219_v0 = vmov 0.0   ;;  %v61_v1 = vld [vmem:[%s1498_s2 + $0x8] sm:$0xff]  ;;  %v63_v2 = vld [vmem:[%s1498_s2 + $0x18] sm:$0xff]  ;;  %vm306_vm0 = vcmask 1045504  }
  0x27   :  { %156 = vmatprep.mubr.f32.mxu0 %v1219_v0  ;;  %v60_v3 = vld [vmem:[%s1498_s2] sm:$0xff]  ;;  %v966_v4 = vpack.c.bf16 %v63_v2, %v61_v1  ;;  %v62_v5 = vld [vmem:[%s1498_s2 + $0x10] sm:$0xff]  ;;  %v65_v6 = vld [vmem:[%s1498_s2 + $0x28] sm:$0xff]  ;;  %vm299_vm1 = vcmask 179200   ;;  %vm777_vm2 = vcmask 130048  }
  0x28   :  { %v67_v7 = vld [vmem:[%s1498_s2 + $0x38] sm:$0xff]  ;;  %v968_v8 = vpack.c.bf16 %v62_v5, %v60_v3  ;;  %v64_v10 = vld [vmem:[%s1498_s2 + $0x20] sm:$0xff]  ;;  %v66_v11 = vld [vmem:[%s1498_s2 + $0x30] sm:$0xff] }
  0x29   :  { %v970_v9 = vpack.c.bf16 %v67_v7, %v65_v6  ;;  %v69_v12 = vld [vmem:[%s1498_s2 + $0x48] sm:$0xff]  ;;  %967 = vmatprep.subr.bf16.mxu0 %v966_v4  ;;  %v71_v13 = vld [vmem:[%s1498_s2 + $0x58] sm:$0xff]  ;;  %v972_v14 = vpack.c.bf16 %v66_v11, %v64_v10  ;;  %v68_v16 = vld [vmem:[%s1498_s2 + $0x40] sm:$0xff] }
  0x2a   :  { %969 = vmatpush1.bf16.msra.mxu0 %v968_v8  ;;  %v974_v15 = vpack.c.bf16 %v71_v13, %v69_v12  ;;  %v70_v17 = vld [vmem:[%s1498_s2 + $0x50] sm:$0xff]  ;;  %v73_v18 = vld [vmem:[%s1498_s2 + $0x68] sm:$0xff]  ;;  %v75_v19 = vld [vmem:[%s1498_s2 + $0x78] sm:$0xff] }
  0x2b   :  { %971 = vmatprep.subr.bf16.mxu0 %v970_v9  ;;  %v976_v20 = vpack.c.bf16 %v70_v17, %v68_v16  ;;  %v978_v21 = vpack.c.bf16 %v75_v19, %v73_v18  ;;  %v72_v22 = vld [vmem:[%s1498_s2 + $0x60] sm:$0xff]  ;;  %v74_v23 = vld [vmem:[%s1498_s2 + $0x70] sm:$0xff]  ;;  %v77_v24 = vld [vmem:[%s1498_s2 + $0x88] sm:$0xff] }
  0x2c   :  { %v79_v25 = vld [vmem:[%s1498_s2 + $0x98] sm:$0xff]  ;;  %v76_v26 = vld [vmem:[%s1498_s2 + $0x80] sm:$0xff]  ;;  %v78_v27 = vld [vmem:[%s1498_s2 + $0x90] sm:$0xff]  ;;  %v980_v28 = vpack.c.bf16 %v74_v23, %v72_v22 }
  0x2d   :  { %v208_v29 = vld [vmem:[#allocation2 + $0x80] sm:$0xff]  ;;  %v209_v30 = vld [vmem:[#allocation2 + $0x88] sm:$0xff]  ;;  %v982_v32 = vpack.c.bf16 %v79_v25, %v77_v24  ;;  %v83_v34 = vld [vmem:[%s1498_s2 + $0xb8] sm:$0xff]  ;;  %v984_v44 = vpack.c.bf16 %v78_v27, %v76_v26  ;;  %v1220_v27 = vmov 0.0|0.0  }
  0x2e   :  { %973 = vmatpush1.bf16.msra.mxu0 %v972_v14  ;;  %v192_v31 = vld [vmem:[#allocation2] sm:$0xff]  ;;  %v81_v33 = vld [vmem:[%s1498_s2 + $0xa8] sm:$0xff]  ;;  %v998_v35 = vpack.c.bf16 %v209_v30, %v208_v29  ;;  %v210_v38 = vld [vmem:[#allocation2 + $0x90] sm:$0xff] }
  0x2f   :  { %975 = vmatprep.subr.bf16.mxu0 %v974_v15  ;;  %v193_v36 = vld [vmem:[#allocation2 + $0x8] sm:$0xff]  ;;  %v211_v39 = vld [vmem:[#allocation2 + $0x98] sm:$0xff]  ;;  %v194_v40 = vld [vmem:[#allocation2 + $0x10] sm:$0xff]  ;;  %v986_v49 = vpack.c.bf16 %v83_v34, %v81_v33 }
  0x30   :  { %v1000_v37 = vpack.c.bf16 %v193_v36, %v192_v31  ;;  %v80_v41 = vld [vmem:[%s1498_s2 + $0xa0] sm:$0xff]  ;;  %999 = vmatprep.subr.bf16.mxu1 %v998_v35  ;;  %v1002_v42 = vpack.c.bf16 %v211_v39, %v210_v38  ;;  %v195_v43 = vld [vmem:[#allocation2 + $0x18] sm:$0xff]  ;;  %v82_v45 = vld [vmem:[%s1498_s2 + $0xb0] sm:$0xff] }
  0x31   :  { %v1004_v46 = vpack.c.bf16 %v195_v43, %v194_v40  ;;  %v212_v47 = vld [vmem:[#allocation2 + $0xa0] sm:$0xff]  ;;  %v213_v48 = vld [vmem:[#allocation2 + $0xa8] sm:$0xff]  ;;  %v87_v54 = vld [vmem:[%s1498_s2 + $0xd8] sm:$0xff]  ;;  %v988_v57 = vpack.c.bf16 %v82_v45, %v80_v41 }
  0x32   :  { %977 = vmatpush1.bf16.msra.mxu0 %v976_v20  ;;  %1001 = vmatpush3.bf16.msra.mxu1 %v1000_v37  ;;  %v85_v50 = vld [vmem:[%s1498_s2 + $0xc8] sm:$0xff]  ;;  %v1006_v51 = vpack.c.bf16 %v213_v48, %v212_v47  ;;  %v196_v52 = vld [vmem:[#allocation2 + $0x20] sm:$0xff]  ;;  %v214_v55 = vld [vmem:[#allocation2 + $0xb0] sm:$0xff] }
  0x33   :  { %979 = vmatprep.subr.bf16.mxu0 %v978_v21  ;;  %1003 = vmatprep.subr.bf16.mxu1 %v1002_v42  ;;  %v197_v53 = vld [vmem:[#allocation2 + $0x28] sm:$0xff]  ;;  %v215_v56 = vld [vmem:[#allocation2 + $0xb8] sm:$0xff]  ;;  %v84_v58 = vld [vmem:[%s1498_s2 + $0xc0] sm:$0xff]  ;;  %v990_v61 = vpack.c.bf16 %v87_v54, %v85_v50 }
  0x34   :  { %v86_v59 = vld [vmem:[%s1498_s2 + $0xd0] sm:$0xff]  ;;  %v1008_v60 = vpack.c.bf16 %v197_v53, %v196_v52  ;;  %v89_v62 = vld [vmem:[%s1498_s2 + $0xe8] sm:$0xff]  ;;  %v1010_v63 = vpack.c.bf16 %v215_v56, %v214_v55  ;;  %v199_v2 = vld [vmem:[#allocation2 + $0x38] sm:$0xff] }
  0x35   :  { %v198_v1 = vld [vmem:[#allocation2 + $0x30] sm:$0xff]  ;;  %v91_v3 = vld [vmem:[%s1498_s2 + $0xf8] sm:$0xff]  ;;  %v216_v4 = vld [vmem:[#allocation2 + $0xc0] sm:$0xff]  ;;  %v992_v6 = vpack.c.bf16 %v86_v59, %v84_v58 }
  0x36   :  { %981 = vmatpush1.bf16.msra.mxu0 %v980_v28  ;;  %1005 = vmatpush3.bf16.msra.mxu1 %v1004_v46  ;;  %v217_v5 = vld [vmem:[#allocation2 + $0xc8] sm:$0xff]  ;;  %v88_v7 = vld [vmem:[%s1498_s2 + $0xe0] sm:$0xff]  ;;  %v1012_v8 = vpack.c.bf16 %v199_v2, %v198_v1  ;;  %v994_v9 = vpack.c.bf16 %v91_v3, %v89_v62  ;;  %v90_v10 = vld [vmem:[%s1498_s2 + $0xf0] sm:$0xff] }
  0x37   :  { %983 = vmatprep.subr.bf16.mxu0 %v982_v32  ;;  %1007 = vmatprep.subr.bf16.mxu1 %v1006_v51  ;;  %v1014_v11 = vpack.c.bf16 %v217_v5, %v216_v4  ;;  %v200_v12 = vld [vmem:[#allocation2 + $0x40] sm:$0xff]  ;;  %v201_v13 = vld [vmem:[#allocation2 + $0x48] sm:$0xff]  ;;  %v218_v14 = vld [vmem:[#allocation2 + $0xd0] sm:$0xff]  ;;  %v996_v16 = vpack.c.bf16 %v90_v10, %v88_v7 }
  0x38   :  { %v219_v15 = vld [vmem:[#allocation2 + $0xd8] sm:$0xff]  ;;  %v1016_v17 = vpack.c.bf16 %v201_v13, %v200_v12  ;;  %v173_v18 = vld [vmem:[%s1499_s3] sm:$0xff]  ;;  %v174_v19 = vld [vmem:[%s1499_s3 + $0x8] sm:$0xff] }
  0x39   :  { %v1018_v20 = vpack.c.bf16 %v219_v15, %v218_v14  ;;  %v202_v21 = vld [vmem:[#allocation2 + $0x50] sm:$0xff]  ;;  %v203_v22 = vld [vmem:[#allocation2 + $0x58] sm:$0xff]  ;;  %v220_v23 = vld [vmem:[#allocation2 + $0xe0] sm:$0xff]  ;;  %v1031_v26 = vpack.c.bf16 %v174_v19, %v173_v18 }
  0x3a   :  { %985 = vmatpush1.bf16.msra.mxu0 %v984_v44  ;;  %1009 = vmatpush3.bf16.msra.mxu1 %v1008_v60  ;;  %v221_v24 = vld [vmem:[#allocation2 + $0xe8] sm:$0xff]  ;;  %v58_v25 = vld [vmem:[%s1497_s1] sm:$0xff]  ;;  %v175_v28 = vld [vmem:[%s1499_s3 + $0x10] sm:$0xff]  ;;  %v1020_v30 = vpack.c.bf16 %v203_v22, %v202_v21 }
  0x3b   :  { %987 = vmatprep.subr.bf16.mxu0 %v986_v49  ;;  %1011 = vmatprep.subr.bf16.mxu1 %v1010_v63  ;;  %v176_v29 = vld [vmem:[%s1499_s3 + $0x18] sm:$0xff]  ;;  %v1022_v31 = vpack.c.bf16 %v221_v24, %v220_v23  ;;  %v204_v32 = vld [vmem:[#allocation2 + $0x60] sm:$0xff]  ;;  %v205_v33 = vld [vmem:[#allocation2 + $0x68] sm:$0xff] }
  0x3c   :  { %v222_v34 = vld [vmem:[#allocation2 + $0xf0] sm:$0xff]  ;;  %v223_v35 = vld [vmem:[#allocation2 + $0xf8] sm:$0xff]  ;;  %v59_v36 = vld [vmem:[%s1497_s1 + $0x8] sm:$0xff]  ;;  %v1034_v37 = vpack.c.bf16 %v176_v29, %v175_v28  ;;  %v1024_v40 = vpack.c.bf16 %v205_v33, %v204_v32 }
  0x3d   :  { %v177_v38 = vld [vmem:[%s1499_s3 + $0x20] sm:$0xff]  ;;  %v178_v39 = vld [vmem:[%s1499_s3 + $0x28] sm:$0xff]  ;;  %v1026_v41 = vpack.c.bf16 %v223_v35, %v222_v34  ;;  %v179_v43 = vld [vmem:[%s1499_s3 + $0x30] sm:$0xff] }
  0x3e   :  { %989 = vmatpush1.bf16.msra.mxu0 %v988_v57  ;;  %1013 = vmatpush3.bf16.msra.mxu1 %v1012_v8  ;;  %v1037_v42 = vpack.c.bf16 %v178_v39, %v177_v38  ;;  %v180_v44 = vld [vmem:[%s1499_s3 + $0x38] sm:$0xff]  ;;  %v181_v46 = vld [vmem:[%s1499_s3 + $0x40] sm:$0xff]  ;;  %v182_v47 = vld [vmem:[%s1499_s3 + $0x48] sm:$0xff] }
  0x3f   :  { %991 = vmatprep.subr.bf16.mxu0 %v990_v61  ;;  %1015 = vmatprep.subr.bf16.mxu1 %v1014_v11  ;;  %v1040_v45 = vpack.c.bf16 %v180_v44, %v179_v43  ;;  %v1043_v48 = vpack.c.bf16 %v182_v47, %v181_v46  ;;  %v183_v49 = vld [vmem:[%s1499_s3 + $0x50] sm:$0xff]  ;;  %v184_v50 = vld [vmem:[%s1499_s3 + $0x58] sm:$0xff]  ;;  %v185_v52 = vld [vmem:[%s1499_s3 + $0x60] sm:$0xff] }
  0x40   :  { %v1046_v51 = vpack.c.bf16 %v184_v50, %v183_v49  ;;  %v186_v53 = vld [vmem:[%s1499_s3 + $0x68] sm:$0xff]  ;;  %v187_v55 = vld [vmem:[%s1499_s3 + $0x70] sm:$0xff]  ;;  %v188_v56 = vld [vmem:[%s1499_s3 + $0x78] sm:$0xff] }
  0x41   :  { %v1049_v54 = vpack.c.bf16 %v186_v53, %v185_v52  ;;  %v1052_v57 = vpack.c.bf16 %v188_v56, %v187_v55  ;;  %v206_v58 = vld [vmem:[#allocation2 + $0x70] sm:$0xff]  ;;  %v207_v59 = vld [vmem:[#allocation2 + $0x78] sm:$0xff]  ;;  %v189_v60 = vld [vmem:[%s1499_s3 + $0x80] sm:$0xff] }
  0x42   :  { %993 = vmatpush1.bf16.msra.mxu0 %v992_v6  ;;  %1017 = vmatpush3.bf16.msra.mxu1 %v1016_v17  ;;  %v1028_v61 = vpack.c.bf16 %v207_v59, %v206_v58  ;;  %v190_v62 = vld [vmem:[%s1499_s3 + $0x88] sm:$0xff]  ;;  %v191_v1 = vld [vmem:[%s1499_s3 + $0x90] sm:$0x3f]  ;;  %v169_v3 = vld [vmem:[%s1496_s0] sm:$0xff] }
  0x43   :  { %995 = vmatprep.subr.bf16.mxu0 %v994_v9  ;;  %1019 = vmatprep.subr.bf16.mxu1 %v1018_v20  ;;  %v1055_v63 = vpack.c.bf16 %v190_v62, %v189_v60  ;;  %v170_v2 = vld [vmem:[%s1496_s0 + $0x8] sm:$0xff]  ;;  %v172_v4 = vld [vmem:[%s1496_s0 + $0x18] sm:$0xff]  ;;  %v171_v5 = vld [vmem:[%s1496_s0 + $0x10] sm:$0xff]  ;;  %v385_v62 = vlaneseq }
  0x44   :  { %v393_v6 = vld [vmem:[#allocation4] sm:$0xff]  ;;  %v491_v38 = vld [vmem:[#allocation4 + $0x10] sm:$0xff]  ;;  %v498_v44 = vld [vmem:[#allocation4 + $0x58] sm:$0xff] }
  0x45   :  { %v394_v7 = vld [vmem:[#allocation4 + $0x20] sm:$0xff]  ;;  %v494_v39 = vld [vmem:[#allocation4 + $0x30] sm:$0xff]  ;;  %v504_v47 = vld [vmem:[#allocation4 + $0x98] sm:$0xff] }
  0x46   :  { %997 = vmatpush1.bf16.msra.mxu0 %v996_v16  ;;  %1021 = vmatpush3.bf16.msra.mxu1 %v1020_v30  ;;  %v1057_v8 = vpack.c.bf16 %v394_v7, %v393_v6  ;;  %v395_v9 = vld [vmem:[#allocation4 + $0x40] sm:$0xff]  ;;  %v510_v50 = vld [vmem:[#allocation4 + $0xd8] sm:$0xff] }
  0x47   :  { %1030 = vmatprep.subr.bf16.mxu0 %v1220_v27  ;;  %1023 = vmatprep.subr.bf16.mxu1 %v1022_v31  ;;  %v396_v10 = vld [vmem:[#allocation4 + $0x60] sm:$0xff]  ;;  %v516_v53 = vld [vmem:[#allocation4 + $0x118] sm:$0xff] }
  0x48   :  { %v1061_v13 = vpack.c.bf16 %v396_v10, %v395_v9  ;;  %v397_v14 = vld [vmem:[#allocation4 + $0x80] sm:$0xff]  ;;  %v522_v56 = vld [vmem:[#allocation4 + $0x158] sm:$0xff] }
  0x49   :  { %157 = vmatmul.mubr.f32.vlgmr.msra.gmra.mrb[0].mxu0 %v58_v25  ;;  %v398_v15 = vld [vmem:[#allocation4 + $0xa0] sm:$0xff]  ;;  %v528_v59 = vld [vmem:[#allocation4 + $0x198] sm:$0xff] }
  0x4a   :  { %162 = vmatprep.mubr.f32.mxu0 %v1219_v0  ;;  %1032 = vmatpush1.bf16.msra.mxu0 %v1031_v26  ;;  %v1065_v18 = vpack.c.bf16 %v398_v15, %v397_v14  ;;  %v399_v19 = vld [vmem:[#allocation4 + $0xc0] sm:$0xff]  ;;  %v531_v60 = vld [vmem:[#allocation4 + $0x1b8] sm:$0xff]  ;;  %v490_v14 = vld [vmem:[#allocation4 + $0x8] sm:$0xff] }
  0x4b   :  { %1033 = vmatprep.subr.bf16.mxu0 %v1220_v27  ;;  %1025 = vmatpush3.bf16.msra.mxu1 %v1024_v40  ;;  %v400_v20 = vld [vmem:[#allocation4 + $0xe0] sm:$0xff]  ;;  %v1089_v40 = vpack.c.bf16 %v494_v39, %v491_v38  ;;  %v493_v15 = vld [vmem:[#allocation4 + $0x28] sm:$0xff] }
  0x4c   :  { %1027 = vmatprep.subr.bf16.mxu1 %v1026_v41  ;;  %v1069_v21 = vpack.c.bf16 %v400_v20, %v399_v19  ;;  %v401_v22 = vld [vmem:[#allocation4 + $0x100] sm:$0xff]  ;;  %v492_v41 = vld [vmem:[#allocation4 + $0x18] sm:$0xff]  ;;  %v1091_v19 = vpack.c.bf16 %v493_v15, %v490_v14 }
  0x4d   :  { %163 = vmatmul.mubr.f32.gmra.mrb[2].mxu0 %v59_v36  ;;  %v402_v23 = vld [vmem:[#allocation4 + $0x120] sm:$0xff] }
  0x4e   :  { %1035 = vmatpush1.bf16.msra.mxu0 %v1034_v37  ;;  %809 = vmatprep.mubr.msk.f32.mxu0 %vm299_vm1, %v170_v2  ;;  %v1073_v24 = vpack.c.bf16 %v402_v23, %v401_v22  ;;  %v403_v25 = vld [vmem:[#allocation4 + $0x140] sm:$0xff]  ;;  %v1470_v2 = vld [vmem:[%s1502_s6 + $0x8] sm:$0xf] }
  0x4f   :  { %1036 = vmatprep.subr.bf16.mxu0 %v1220_v27  ;;  %1029 = vmatpush3.bf16.msra.mxu1 %v1028_v61  ;;  %v404_v26 = vld [vmem:[#allocation4 + $0x160] sm:$0xff]  ;;  %v1145_v61 = vpack.c.bf16 %v531_v60, %v528_v59  ;;  %v496_v22 = vld [vmem:[#allocation4 + $0x48] sm:$0xff] }
  0x50   :  { %1058 = vmatprep.subr.bf16.mxu1 %v1057_v8  ;;  %v405_v29 = vld [vmem:[#allocation4 + $0x180] sm:$0xff]  ;;  %v499_v23 = vld [vmem:[#allocation4 + $0x68] sm:$0xff] }
  0x51   :  { %v406_v30 = vld [vmem:[#allocation4 + $0x1a0] sm:$0xff]  ;;  %v535_v59 = vld [vmem:[#allocation4 + $0x1e8] sm:$0xff] }
  0x52   :  { %1038 = vmatpush1.bf16.msra.mxu0 %v1037_v42  ;;  %v1081_v32 = vpack.c.bf16 %v406_v30, %v405_v29  ;;  %v407_v34 = vld [vmem:[#allocation4 + $0x1c0] sm:$0xff]  ;;  %v495_v42 = vld [vmem:[#allocation4 + $0x38] sm:$0xff]  ;;  %v505_v29 = vld [vmem:[#allocation4 + $0xa8] sm:$0xff] }
  0x53   :  { %1039 = vmatprep.subr.bf16.mxu0 %v1220_v27  ;;  %v408_v35 = vld [vmem:[#allocation4 + $0x1e0] sm:$0xff]  ;;  %v1121_v43 = vpack.c.bf16 %v495_v42, %v492_v41  ;;  %v509_v30 = vld [vmem:[#allocation4 + $0xd0] sm:$0xff]  ;;  %v517_v41 = vld [vmem:[#allocation4 + $0x128] sm:$0xff] }
  0x54   :  { %v1085_v37 = vpack.c.bf16 %v408_v35, %v407_v34  ;;  %v508_v34 = vld [vmem:[#allocation4 + $0xc8] sm:$0xff]  ;;  %v521_v42 = vld [vmem:[#allocation4 + $0x150] sm:$0xff]  ;;  %v56_v14 = vld [vmem:[%s1502_s6] sm:$0xff] }
  0x55   :  { %v511_v35 = vld [vmem:[#allocation4 + $0xe8] sm:$0xff] }
  0x56   :  { %1041 = vmatpush1.bf16.msra.mxu0 %v1040_v45  ;;  %v501_v45 = vld [vmem:[#allocation4 + $0x78] sm:$0xff]  ;;  %v1103_v38 = vpack.c.bf16 %v511_v35, %v508_v34 }
  0x57   :  { %1042 = vmatprep.subr.bf16.mxu0 %v1220_v27  ;;  %v1125_v46 = vpack.c.bf16 %v501_v45, %v498_v44 }
  0x5a   :  { %1044 = vmatpush1.bf16.msra.mxu0 %v1043_v48  ;;  %v507_v48 = vld [vmem:[#allocation4 + $0xb8] sm:$0xff] }
  0x5b   :  { %1045 = vmatprep.subr.bf16.mxu0 %v1220_v27  ;;  %v1129_v49 = vpack.c.bf16 %v507_v48, %v504_v47  ;;  %v523_v47 = vld [vmem:[#allocation4 + $0x168] sm:$0xff]  ;;  %v527_v48 = vld [vmem:[#allocation4 + $0x190] sm:$0xff] }
  0x5e   :  { %1047 = vmatpush1.bf16.msra.mxu0 %v1046_v51  ;;  %v513_v51 = vld [vmem:[#allocation4 + $0xf8] sm:$0xff] }
  0x5f   :  { %1048 = vmatprep.subr.bf16.mxu0 %v1220_v27  ;;  %v1133_v52 = vpack.c.bf16 %v513_v51, %v510_v50 }
  0x62   :  { %1050 = vmatpush1.bf16.msra.mxu0 %v1049_v54  ;;  %v519_v54 = vld [vmem:[#allocation4 + $0x138] sm:$0xff] }
  0x63   :  { %1051 = vmatprep.subr.bf16.mxu0 %v1220_v27  ;;  %v1137_v55 = vpack.c.bf16 %v519_v54, %v516_v53  ;;  %v529_v53 = vld [vmem:[#allocation4 + $0x1a8] sm:$0xff]  ;;  %v533_v54 = vld [vmem:[#allocation4 + $0x1d0] sm:$0xff] }
  0x66   :  { %1053 = vmatpush1.bf16.msra.mxu0 %v1052_v57  ;;  %v525_v57 = vld [vmem:[#allocation4 + $0x178] sm:$0xff] }
  0x67   :  { %1054 = vmatprep.subr.bf16.mxu0 %v1220_v27  ;;  %v1077_v27 = vpack.c.bf16 %v404_v26, %v403_v25  ;;  %v1141_v58 = vpack.c.bf16 %v525_v57, %v522_v56  ;;  %v506_v25 = vld [vmem:[#allocation4 + $0xb0] sm:$0xff]  ;;  %v1095_v26 = vpack.c.bf16 %v499_v23, %v496_v22 }
  0x6a   :  { %1056 = vmatpush1.bf16.msra.mxu0 %v1055_v63  ;;  %v1464_v63 = vshrl.u32 %v385_v62, 7  ;;  %v537_v62 = vld [vmem:[#allocation4 + $0x1f8] sm:$0xff] }
  0x6b   :  { %346 = vmatprep.subr.mxu0 %v1219_v0 }
  0x6e   :  { %808 = vmatpush1.msk.msra.mxu0 %vm306_vm0, %v191_v1  ;;  %v387_v1 = vsub.s32 0, %v1464_v63 }
  0x6f   :  { %375 = vmatmul.mubr.f32.vlgmr.msra.gmra.mrb[4].mxu0 %v169_v3  ;;  %1122 = vmatprep.subr.bf16.mxu0 %v1121_v43 }
  0x70   :  { %810 = vmatprep.mubr.msk.f32.mxu0 %vm299_vm1, %v172_v4  ;;  %1124 = vmatpush3.bf16.msra.mxu0 %v1121_v43  ;;  %v388_v6 = vrot.slane %v1470_v2, %v387_v1  ;;  %v524_v43 = vld [vmem:[#allocation4 + $0x170] sm:$0xff] }
  0x71   :  { %1126 = vmatprep.subr.bf16.mxu0 %v1125_v46  ;;  %v1109_v45 = vpack.c.bf16 %v524_v43, %v521_v42 }
  0x73   :  { %380 = vmatmul.mubr.f32.gmra.mrb[6].mxu0 %v171_v5 }
  0x74   :  { %1128 = vmatpush3.bf16.msra.mxu0 %v1125_v46  ;;  %v520_v46 = vld [vmem:[#allocation4 + $0x148] sm:$0xff] }
  0x75   :  { %1130 = vmatprep.subr.bf16.mxu0 %v1129_v49  ;;  %v1111_v50 = vpack.c.bf16 %v523_v47, %v520_v46 }
  0x78   :  { %1132 = vmatpush3.bf16.msra.mxu0 %v1129_v49  ;;  %v530_v49 = vld [vmem:[#allocation4 + $0x1b0] sm:$0xff] }
  0x79   :  { %1134 = vmatprep.subr.bf16.mxu0 %v1133_v52  ;;  %v1113_v51 = vpack.c.bf16 %v530_v49, %v527_v48 }
  0x7c   :  { %1136 = vmatpush3.bf16.msra.mxu0 %v1133_v52  ;;  %v526_v52 = vld [vmem:[#allocation4 + $0x188] sm:$0xff] }
  0x7d   :  { %1138 = vmatprep.subr.bf16.mxu0 %v1137_v55  ;;  %v1115_v56 = vpack.c.bf16 %v529_v53, %v526_v52 }
  0x80   :  { %1140 = vmatpush3.bf16.msra.mxu0 %v1137_v55  ;;  %v536_v55 = vld [vmem:[#allocation4 + $0x1f0] sm:$0xff] }
  0x81   :  { %1142 = vmatprep.subr.bf16.mxu0 %v1141_v58  ;;  %v1117_v57 = vpack.c.bf16 %v536_v55, %v533_v54 }
  0x84   :  { %1144 = vmatpush3.bf16.msra.mxu0 %v1141_v58  ;;  %v532_v58 = vld [vmem:[#allocation4 + $0x1c8] sm:$0xff] }
  0x85   :  { %1146 = vmatprep.subr.bf16.mxu0 %v1145_v61  ;;  %v1119_v60 = vpack.c.bf16 %v535_v59, %v532_v58 }
  0x88   :  { %1148 = vmatpush3.bf16.msra.mxu0 %v1145_v61  ;;  %v534_v61 = vld [vmem:[#allocation4 + $0x1d8] sm:$0xff] }
  0x89   :  { %v1149_v1 = vpack.c.bf16 %v537_v62, %v534_v61 }
  0x8b   :  { %1150 = vmatprep.subr.bf16.mxu0 %v1149_v1 }
  0x8c   :  { %1152 = vmatpush3.bf16.msra.mxu0 %v1149_v1 }
 0x11c   :  { %v158_v11 = vpop.f32.mrb[0].mxu0 }
 0x11d   :  { %v160_v12 = vpop.f32.mrb[1].mxu0 }
 0x11e   :  { %288 = vmatprep.mubr.f32.mxu1 %v160_v12 }
 0x11f   :  { %289 = vmatmul.mubr.f32.vlgmr.msra.gmra.mrb[0].mxu1 %v158_v11 }
 0x120   :  { %v164_v16 = vpop.f32.mrb[2].mxu0  ;;  %1060 = vmatpush3.bf16.msra.mxu1 %v1057_v8 }
 0x121   :  { %v166_v17 = vpop.f32.mrb[3].mxu0  ;;  %1062 = vmatprep.subr.bf16.mxu1 %v1061_v13 }
 0x122   :  { %293 = vmatprep.mubr.f32.mxu1 %v166_v17  ;;  %v500_v17 = vld [vmem:[#allocation4 + $0x70] sm:$0xff] }
 0x123   :  { %294 = vmatmul.mubr.f32.gmra.mrb[2].mxu1 %v164_v16  ;;  %v497_v16 = vld [vmem:[#allocation4 + $0x50] sm:$0xff] }
 0x124   :  { %1064 = vmatpush3.bf16.msra.mxu1 %v1061_v13 }
 0x125   :  { %1066 = vmatprep.subr.bf16.mxu1 %v1065_v18 }
 0x128   :  { %1068 = vmatpush3.bf16.msra.mxu1 %v1065_v18 }
 0x129   :  { %1070 = vmatprep.subr.bf16.mxu1 %v1069_v21 }
 0x12c   :  { %1072 = vmatpush3.bf16.msra.mxu1 %v1069_v21  ;;  %v1093_v21 = vpack.c.bf16 %v500_v17, %v497_v16 }
 0x12d   :  { %1074 = vmatprep.subr.bf16.mxu1 %v1073_v24 }
 0x130   :  { %1076 = vmatpush3.bf16.msra.mxu1 %v1073_v24  ;;  %v503_v24 = vld [vmem:[#allocation4 + $0x90] sm:$0xff] }
 0x131   :  { %1078 = vmatprep.subr.bf16.mxu1 %v1077_v27 }
 0x134   :  { %1080 = vmatpush3.bf16.msra.mxu1 %v1077_v27  ;;  %v1097_v27 = vpack.c.bf16 %v506_v25, %v503_v24  ;;  %v698_v25 = vsub.s32 3, %v1464_v63 }
 0x135   :  { %1082 = vmatprep.subr.bf16.mxu1 %v1081_v32 }
 0x138   :  { %1084 = vmatpush3.bf16.msra.mxu1 %v1081_v32 }
 0x139   :  { %1086 = vmatprep.subr.bf16.mxu1 %v1085_v37 }
 0x13c   :  { %1088 = vmatpush3.bf16.msra.mxu1 %v1085_v37  ;;  %v518_v37 = vld [vmem:[#allocation4 + $0x130] sm:$0xff] }
 0x13d   :  { %1090 = vmatprep.subr.bf16.mxu1 %v1089_v40  ;;  %v514_v40 = vld [vmem:[#allocation4 + $0x108] sm:$0xff] }
 0x13e   :  { %v1107_v44 = vpack.c.bf16 %v517_v41, %v514_v40 }
 0x142   :  { %v376_v28 = vpop.f32.mrb[4].mxu0 }
 0x143   :  { %v378_v31 = vpop.f32.mrb[5].mxu0 }
 0x144   :  { %v512_v31 = vld [vmem:[#allocation4 + $0xf0] sm:$0xff] }
 0x146   :  { %v381_v33 = vpop.f32.mrb[6].mxu0 }
 0x147   :  { %v383_v36 = vpop.f32.mrb[7].mxu0 }
 0x148   :  { %v515_v36 = vld [vmem:[#allocation4 + $0x110] sm:$0xff] }
 0x149   :  { %v1105_v39 = vpack.c.bf16 %v518_v37, %v515_v36 }
 0x1f2   :  { %v843_v3 = vpop.f32.mrb[0].mxu1 }
 0x1f3   :  { %v844_v4 = vpop.f32.mrb[1].mxu1 }
 0x1f4   :  { %v845_v5 = vadd.f32 %v844_v4, %v843_v3  ;;  %v411_v3 = vsub.s32 1, %v1464_v63 }
 0x1f6   :  { %v377_v7 = vadd.f32 %v845_v5, %v376_v28  ;;  %v846_v8 = vpop.f32.mrb[2].mxu1  ;;  %v502_v28 = vld [vmem:[#allocation4 + $0x88] sm:$0xff]  ;;  %v412_v4 = vrot.slane %v1470_v2, %v411_v3 }
 0x1f7   :  { %v847_v9 = vpop.f32.mrb[3].mxu1  ;;  %v1099_v32 = vpack.c.bf16 %v505_v29, %v502_v28 }
 0x1f8   :  { %v389_v10 = vadd.f32 %v388_v6, %v377_v7  ;;  %v848_v11 = vadd.f32 %v847_v9, %v846_v8 }
 0x1fa   :  { %v391_v12 = vmax.f32 %v389_v10, 0.0  ;;  %v382_v13 = vadd.f32 %v848_v11, %v381_v33  ;;  %v1101_v33 = vpack.c.bf16 %v512_v31, %v509_v30  ;;  %v699_v30 = vrot.slane %v1470_v2, %v698_v25 }
 0x1fc   :  { %v390_v18 = vadd.f32 %v388_v6, %v382_v13  ;;  %921 = vmatprep.mubr.f32.mxu1 %v391_v12  ;;  %v692_v12 = vsub.s32 2, %v1464_v63 }
 0x1fe   :  { %v392_v20 = vmax.f32 %v390_v18, 0.0  ;;  %v693_v13 = vrot.slane %v1470_v2, %v692_v12 }
 0x200   :  { %922 = vmatmul.mubr.f32.vlgmr.msra.gmra.mrb[4].mxu1 %v392_v20 }
 0x201   :  { %1092 = vmatpush1.bf16.msra.mxu1 %v1091_v19  ;;  %602 = vmatprep.mubr.f32.mxu1 %v1219_v0 }
 0x202   :  { %1094 = vmatprep.subr.bf16.mxu1 %v1093_v21 }
 0x205   :  { %1096 = vmatpush1.bf16.msra.mxu1 %v1095_v26 }
 0x206   :  { %1098 = vmatprep.subr.bf16.mxu1 %v1097_v27 }
 0x209   :  { %1100 = vmatpush1.bf16.msra.mxu1 %v1099_v32 }
 0x20a   :  { %1102 = vmatprep.subr.bf16.mxu1 %v1101_v33 }
 0x20d   :  { %1104 = vmatpush1.bf16.msra.mxu1 %v1103_v38 }
 0x20e   :  { %1106 = vmatprep.subr.bf16.mxu1 %v1105_v39 }
 0x211   :  { %1108 = vmatpush1.bf16.msra.mxu1 %v1107_v44 }
 0x212   :  { %1110 = vmatprep.subr.bf16.mxu1 %v1109_v45 }
 0x215   :  { %1112 = vmatpush1.bf16.msra.mxu1 %v1111_v50 }
 0x216   :  { %1114 = vmatprep.subr.bf16.mxu1 %v1113_v51 }
 0x219   :  { %1116 = vmatpush1.bf16.msra.mxu1 %v1115_v56 }
 0x21a   :  { %1118 = vmatprep.subr.bf16.mxu1 %v1117_v57 }
 0x21d   :  { %1120 = vmatpush1.bf16.msra.mxu1 %v1119_v60 }
 0x2d3   :  { %v923_v5 = vpop.f32.mrb[4].mxu1 }
 0x2d4   :  { %v485_v6 = vadd.f32 %v923_v5, %v412_v4  ;;  %v479_v7 = vpop.f32.mrb[5].mxu1 }
 0x2d5   :  { %v480_v8 = vadd.f32 %v479_v7, %v412_v4 }
 0x2d6   :  { %v489_v9 = vmax.f32 %v485_v6, 0.0 }
 0x2d7   :  { %v488_v10 = vmax.f32 %v480_v8, 0.0 }
 0x2d9   :  { %603 = vmatmul.mubr.f32.vlgmr.msra.gmra.mrb[6].mxu1 %v488_v10  ;;  %956 = vmatprep.mubr.f32.mxu0 %v488_v10  ;;  %v1153_v11 = vpack.c.bf16 %v489_v9, %v488_v10 }
 0x2da   :  { %957 = vmatmul.mubr.f32.vlgmr.msra.gmra.mrb[8].mxu0 %v489_v9  ;;  %608 = vmatprep.mubr.f32.mxu1 %v1219_v0 }
 0x2db   :  { %1154 = vmatprep.subr.bf16.mxu1 %v1153_v11 }
 0x2dc   :  { %1156 = vmatpush3.bf16.xpose.msra.mxu1 %v1153_v11 }
 0x2dd   :  { %609 = vmatmul.mubr.f32.gmra.mrb[8].mxu1 %v489_v9 }
 0x3ac   :  { %v604_v15 = vpop.f32.mrb[6].mxu1 }
 0x3ad   :  { %v694_v16 = vadd.f32 %v693_v13, %v604_v15  ;;  %v606_v17 = vpop.f32.mrb[7].mxu1  ;;  %v958_v18 = vpop.f32.mrb[8].mxu0 }
 0x3ae   :  { %v780_v19 = vmul.f32 %v606_v17, %v56_v14  ;;  %v681_v20 = vpop.f32.mrb[9].mxu0  ;;  %v701_v39 = vadd.f32 %v958_v18, %v699_v30 }
 0x3af   :  { %963 = vmatprep.mubr.f32.mxu1 %v694_v16  ;;  %v700_v34 = vadd.f32 %v699_v30, %v681_v20 }
 0x3b0   :  { %v781_v21 = vrot.slane %v780_v19, 4  ;;  %v610_v0 = vpop.f32.mrb[8].mxu1 }
 0x3b1   :  { %v695_v22 = vadd.f32 %v693_v13, %v610_v0  ;;  %v612_v23 = vpop.f32.mrb[9].mxu1 }
 0x3b2   :  { %v782_v24 = vadd.f32 %v781_v21, %v780_v19  ;;  %v789_v26 = vmul.f32 %v612_v23, %v56_v14 }
 0x3b3   :  { %964 = vmatmul.mubr.f32.vlgmr.msra.gmra.mrb[10].mxu1 %v695_v22 }
 0x3b4   :  { %v783_v27 = vrot.slane %v782_v24, 2  ;;  %v790_v28 = vrot.slane %v789_v26, 4 }
 0x3b6   :  { %v784_v29 = vadd.f32 %v783_v27, %v782_v24  ;;  %v791_v31 = vadd.f32 %v790_v28, %v789_v26 }
 0x3b8   :  { %v785_v32 = vrot.slane %v784_v29, 1  ;;  %v792_v33 = vrot.slane %v791_v31, 2 }
 0x3ba   :  { %v786_v35 = vadd.f32 %v785_v32, %v784_v29  ;;  %v793_v36 = vadd.f32 %v792_v33, %v791_v31 }
 0x3bc   :  { %v787_v37 = vadd.f32 %v786_v35, %v700_v34  ;;  %v794_v38 = vrot.slane %v793_v36, 1 }
 0x3be   :  { %788 = vst [vmem:[%s1504_s8] sm:$0xff] %v787_v37  ;;  %v795_v63 = vadd.f32 %v794_v38, %v793_v36 }
 0x3c0   :  { %v796_v40 = vadd.f32 %v795_v63, %v701_v39 }
 0x3c2   :  { %797 = vst [vmem:[%s1504_s8 + $0x8] sm:$0xff] %v796_v40 }
 0x486   :  { %v965_v2 = vpop.f32.mrb[10].mxu1 }
 0x487   :  { %779 = vst.msk [vmem:[%s1503_s7 + $0x8] sm:$0xff] %vm777_vm2, %v965_v2  ;;  %v768_v41 = vpop.f32.mrb[11].mxu1 }
 0x488   :  { %778 = vst.msk [vmem:[%s1503_s7] sm:$0xff] %vm777_vm2, %v768_v41 }
 0x489   :  { %806 = vsyncpa [#allocation3], 1 }
 0x48a   :  { %807 = vsyncpa [#allocation5], 1 }

</bundles_post_ra>
